<compile_context>
chip_gen: v7x
topology: tpu7x:2x2x1
jax: 0.10.0
libtpu: 0.0.40
codegen_flags: <defaults>
</compile_context>

<pallas_src>
import functools

import jax
import jax.numpy as jnp
import numpy as np
from jax import lax
from jax.experimental import pallas as pl
from jax.experimental.pallas import tpu as pltpu


def _fw_kernel(vecs_ref, out_ref, gram_ref, *, n_tasks, max_iter, stop_crit):
    """Grid axis 0 tiles the feature (K) dimension of `vecs`."""
    k = pl.program_id(0)

    # ---- Gram matrix accumulation: G += blk @ blk.T (MXU, f32 acc) -------
    @pl.when(k == 0)
    def _():
        gram_ref[...] = jnp.zeros_like(gram_ref)

    blk = vecs_ref[...]                                  # (n_tasks, tk)
    gram_ref[...] += lax.dot_general(
        blk, blk,
        dimension_numbers=(((1,), (1,)), ((), ())),
        preferred_element_type=jnp.float32)

    # ---- Frank-Wolfe iterations on the last K tile ------------------------
    @pl.when(k == pl.num_programs(0) - 1)
    def _():
        n = n_tasks
        G = gram_ref[...]                                # (n, n), symmetric
        col_iota = lax.broadcasted_iota(jnp.int32, (1, n), 1)

        # diag(G) as a (1, n) row — computed once, outside the FW loop.
        row_iota2 = lax.broadcasted_iota(jnp.int32, (n, n), 0)
        col_iota2 = lax.broadcasted_iota(jnp.int32, (n, n), 1)
        diag = jnp.sum(jnp.where(row_iota2 == col_iota2, G, 0.0),
                       axis=0, keepdims=True)            # (1, n)

        sol0 = jnp.full((1, n), 1.0 / n, jnp.float32)

        def cond(carry):
            _, i, change = carry
            return jnp.logical_and(i < max_iter, change >= stop_crit)

        def body(carry):
            sol, i, _ = carry
            # gram_dot_sol = sol @ G  (G symmetric == G @ sol)
            gds = jnp.dot(sol, G, preferred_element_type=jnp.float32)  # (1,n)
            # t = argmin(gds), first occurrence on ties (matches torch.argmin)
            min_val = jnp.min(gds)
            t = jnp.min(jnp.where(gds == min_val, col_iota, n))
            e_t = (col_iota == t).astype(jnp.float32)                  # (1,n)

            v1v1 = jnp.sum(sol * gds)                    # <sol, G sol>
            v1v2 = jnp.sum(gds * e_t)                    # <sol, G[:, t]>
            v2v2 = jnp.sum(diag * e_t)                   # G[t, t]

            # line_solver (analytic 1-D min-norm)
            gamma = jnp.where(
                v1v2 >= v1v1, jnp.float32(0.999),
                jnp.where(
                    v1v2 >= v2v2, jnp.float32(0.001),
                    (v2v2 - v1v2) / (v1v1 + v2v2 - 2.0 * v1v2)))

            new_sol = gamma * sol + (1.0 - gamma) * e_t
            change = jnp.sum(jnp.abs(new_sol - sol))
            return new_sol, i + 1, change

        final_sol, _, _ = lax.while_loop(
            cond, body,
            (sol0, jnp.int32(0), jnp.array(jnp.inf, jnp.float32)))
        out_ref[...] = final_sol


def min_norm_solver_fw(vecs, *, max_iter=250, stop_crit=1e-6,
                       block_bytes=8 << 20):
    """JAX/Pallas equivalent of MinNormSolverFW.forward(vecs)."""
    vecs = jnp.asarray(vecs)
    n_tasks, dim = vecs.shape

    # NOTE: matching the PyTorch module, the n_tasks<=2 paths return a
    # combined dim-length vector while the general path returns the
    # (n_tasks,) simplex weights — this asymmetry is part of the spec.
    if n_tasks == 1:
        return vecs[0]

    if n_tasks == 2:
        v0 = vecs[0].astype(jnp.float32)
        v1 = vecs[1].astype(jnp.float32)
        v1v1 = jnp.dot(v0, v0)
        v1v2 = jnp.dot(v0, v1)
        v2v2 = jnp.dot(v1, v1)
        gamma = jnp.where(
            v1v2 >= v1v1, jnp.float32(0.999),
            jnp.where(v1v2 >= v2v2, jnp.float32(0.001),
                      (v2v2 - v1v2) / (v1v1 + v2v2 - 2.0 * v1v2)))
        gamma = gamma.astype(vecs.dtype)
        return gamma * vecs[0] + (1.0 - gamma) * vecs[1]

    # ---- General path: Gram matrix + Frank-Wolfe in one Pallas kernel ----
    LANE = 128
    itemsize = jnp.dtype(vecs.dtype).itemsize

    # Largest lane-tile that keeps one input block under `block_bytes`
    # (double-buffered by the pipeline -> 2x that in VMEM).
    tk_cap = max(LANE, (int(block_bytes) // (n_tasks * itemsize)) // LANE * LANE)
    dim128 = ((dim + LANE - 1) // LANE) * LANE
    if dim128 <= tk_cap:
        n_steps, tk = 1, dim128
    else:
        n_steps = -(-dim128 // tk_cap)                       # cdiv
        tk = ((-(-dim128 // n_steps)) + LANE - 1) // LANE * LANE
    dim_p = n_steps * tk

    if dim_p != dim:
        # Zero columns do not change G = vecs @ vecs.T.
        vecs = jnp.pad(vecs, ((0, 0), (0, dim_p - dim)))

    kernel = functools.partial(
        _fw_kernel, n_tasks=n_tasks, max_iter=max_iter,
        stop_crit=float(stop_crit))

    out = pl.pallas_call(
        kernel,
        out_shape=jax.ShapeDtypeStruct((1, n_tasks), jnp.float32),
        grid_spec=pltpu.PrefetchScalarGridSpec(
            num_scalar_prefetch=0,
            grid=(n_steps,),
            in_specs=[pl.BlockSpec((n_tasks, tk), lambda k: (0, k))],
            out_specs=pl.BlockSpec((1, n_tasks), lambda k: (0, 0)),
            scratch_shapes=[pltpu.VMEM((n_tasks, n_tasks), jnp.float32)],
        ),
        compiler_params=pltpu.CompilerParams(
            dimension_semantics=("arbitrary",),
            vmem_limit_bytes=32 << 20),
    )(vecs)
    return out[0]


def _ref_fw(vecs, max_iter=250, stop_crit=1e-6):
    """Pure NumPy reference mirroring the PyTorch loop (n_tasks >= 3)."""
    vecs = np.asarray(vecs, np.float32)
    n = vecs.shape[0]
    G = vecs @ vecs.T
    sol = np.full(n, 1.0 / n, np.float32)
    for _ in range(max_iter):
        gds = G @ sol
        t = int(np.argmin(gds))
        v1v1 = float(sol @ gds)
        v1v2 = float(sol @ G[:, t])
        v2v2 = float(G[t, t])
        if v1v2 >= v1v1:
            gamma = 0.999
        elif v1v2 >= v2v2:
            gamma = 0.001
        else:
            gamma = (v2v2 - v1v2) / (v1v1 + v2v2 - 2.0 * v1v2)
        new_sol = gamma * sol
        new_sol[t] += 1.0 - gamma
        if float(np.sum(np.abs(new_sol - sol))) < stop_crit:
            return new_sol
        sol = new_sol
    return sol


def _check(sol, vecs):
    n_tasks = vecs.shape[0]
    assert sol.shape == (n_tasks,)
    assert bool(jnp.all(jnp.isfinite(sol)))
    assert abs(float(jnp.sum(sol)) - 1.0) < 1e-3
    assert float(jnp.min(sol)) >= -1e-6
    np.testing.assert_allclose(np.asarray(sol), _ref_fw(vecs),
                               rtol=1e-2, atol=1e-2)


if __name__ == "__main__":
    key = jax.random.PRNGKey(0)

    # Case 1: lane-aligned dim, single-block grid.
    n_tasks, dim = 4, 512
    vecs = jax.random.normal(key, (n_tasks, dim), dtype=jnp.float32)
    sol = jax.block_until_ready(min_norm_solver_fw(vecs))
    _check(sol, vecs)

    # Case 2: unaligned dim (exercises the zero-padding path).
    key2 = jax.random.PRNGKey(1)
    n_tasks2, dim2 = 6, 300
    vecs2 = jax.random.normal(key2, (n_tasks2, dim2), dtype=jnp.float32)
    sol2 = jax.block_until_ready(min_norm_solver_fw(vecs2))
    _check(sol2, vecs2)

    # Case 3: force a multi-step K grid (small block budget) to exercise the
    # Gram accumulation across grid iterations.
    key3 = jax.random.PRNGKey(2)
    n_tasks3, dim3 = 3, 1024
    vecs3 = jax.random.normal(key3, (n_tasks3, dim3), dtype=jnp.float32)
    sol3 = jax.block_until_ready(
        min_norm_solver_fw(vecs3, block_bytes=n_tasks3 * 256 * 4))
    _check(sol3, vecs3)

    print("KERNEL_OK")
</pallas_src>

<mosaic_0001>
module attributes {stable_mosaic.version = 11 : i64} {
  func.func @_fw_kernel(%arg0: i32, %arg1: memref<4x512xf32, #tpu.memory_space<vmem>>, %arg2: memref<1x4xf32, #tpu.memory_space<vmem>>, %arg3: memref<4x4xf32, #tpu.memory_space<vmem>>) attributes {dimension_semantics = [#tpu.dimension_semantics<arbitrary>], iteration_bounds = array<i64: 1>, scalar_prefetch = 0 : i64, scratch_operands = 1 : i64, tpu.core_type = #tpu.core_type<tc>, window_params = [{transform_indices = @transform_0, window_bounds = array<i64: 4, 512>}, {pipeline_mode = #tpu.pipeline_mode<synchronous>, transform_indices = @transform_1, window_bounds = array<i64: 1, 4>}]} {
    %c0_i32 = arith.constant 0 : i32
    %0 = arith.cmpi eq, %arg0, %c0_i32 : i32
    %1 = arith.extui %0 : i1 to i32
    %c0_i32_0 = arith.constant 0 : i32
    %2 = arith.cmpi ne, %1, %c0_i32_0 : i32
    scf.if %2 {
      %cst_8 = arith.constant 0.000000e+00 : f32
      %11 = vector.broadcast %cst_8 : f32 to vector<4x4xf32>
      %c0_9 = arith.constant 0 : index
      %c0_10 = arith.constant 0 : index
      %12 = vector.load %arg3[%c0_9, %c0_10] : memref<4x4xf32, #tpu.memory_space<vmem>>, vector<4x4xf32>
      tpu.vector_store %arg3[%c0_9, %c0_10], %11 {strides = array<i32>} : memref<4x4xf32, #tpu.memory_space<vmem>>, vector<4x4xf32>,
    } else {
    }
    %c0 = arith.constant 0 : index
    %c0_1 = arith.constant 0 : index
    %3 = vector.load %arg1[%c0, %c0_1] : memref<4x512xf32, #tpu.memory_space<vmem>>, vector<4x512xf32>
    %c0_2 = arith.constant 0 : index
    %c0_3 = arith.constant 0 : index
    %4 = vector.load %arg3[%c0_2, %c0_3] : memref<4x4xf32, #tpu.memory_space<vmem>>, vector<4x4xf32>
    %cst = arith.constant dense<0.000000e+00> : vector<4x4xf32>
    %5 = tpu.matmul %3, %3, %cst {dimension_numbers = #tpu.dot_dimension_numbers<[1], [1], [0], [0], [0, 0, 1, 0], [], []>} : vector<4x512xf32>, vector<4x512xf32>, vector<4x4xf32> -> vector<4x4xf32>
    %6 = arith.addf %4, %5 : vector<4x4xf32>
    %c0_4 = arith.constant 0 : index
    %c0_5 = arith.constant 0 : index
    %7 = vector.load %arg3[%c0_4, %c0_5] : memref<4x4xf32, #tpu.memory_space<vmem>>, vector<4x4xf32>
    tpu.vector_store %arg3[%c0_4, %c0_5], %6 {strides = array<i32>} : memref<4x4xf32, #tpu.memory_space<vmem>>, vector<4x4xf32>,
    %c0_i32_6 = arith.constant 0 : i32
    %8 = arith.cmpi eq, %arg0, %c0_i32_6 : i32
    %9 = arith.extui %8 : i1 to i32
    %c0_i32_7 = arith.constant 0 : i32
    %10 = arith.cmpi ne, %9, %c0_i32_7 : i32
    scf.if %10 {
      %c0_8 = arith.constant 0 : index
      %c0_9 = arith.constant 0 : index
      %11 = vector.load %arg3[%c0_8, %c0_9] : memref<4x4xf32, #tpu.memory_space<vmem>>, vector<4x4xf32>
      %12 = tpu.iota {dimensions = array<i32: 1>} : vector<1x4xi32>
      %13 = tpu.iota {dimensions = array<i32: 0>} : vector<4x4xi32>
      %14 = tpu.iota {dimensions = array<i32: 1>} : vector<4x4xi32>
      %15 = arith.cmpi eq, %13, %14 : vector<4x4xi32>
      %cst_10 = arith.constant 0.000000e+00 : f32
      %16 = vector.broadcast %cst_10 : f32 to vector<4x4xf32>
      %17 = arith.select %15, %11, %16 : vector<4x4xi1>, vector<4x4xf32>
      %cst_11 = arith.constant dense<0.000000e+00> : vector<4xf32>
      %18 = vector.multi_reduction <add>, %17, %cst_11 [0] : vector<4x4xf32> to vector<4xf32>
      %19 = vector.shape_cast %18 : vector<4xf32> to vector<1x4xf32>
      %cst_12 = arith.constant 2.500000e-01 : f32
      %20 = vector.broadcast %cst_12 : f32 to vector<1x4xf32>
      %c0_i32_13 = arith.constant 0 : i32
      %cst_14 = arith.constant 0x7F800000 : f32
      %21:3 = scf.while (%arg4 = %20, %arg5 = %c0_i32_13, %arg6 = %cst_14) : (vector<1x4xf32>, i32, f32) -> (vector<1x4xf32>, i32, f32) {
        %c250_i32 = arith.constant 250 : i32
        %23 = arith.cmpi slt, %arg5, %c250_i32 : i32
        %cst_17 = arith.constant 9.99999997E-7 : f32
        %24 = arith.cmpf oge, %arg6, %cst_17 : f32
        %25 = arith.andi %23, %24 : i1
        scf.condition(%25) %arg4, %arg5, %arg6 : vector<1x4xf32>, i32, f32
      } do {
      ^bb0(%arg4: vector<1x4xf32>, %arg5: i32, %arg6: f32):
        %cst_17 = arith.constant dense<0.000000e+00> : vector<1x4xf32>
        %23 = tpu.matmul %arg4, %11, %cst_17 {dimension_numbers = #tpu.dot_dimension_numbers<[1], [0], [0], [1], [0, 0, 1, 1], [], []>} : vector<1x4xf32>, vector<4x4xf32>, vector<1x4xf32> -> vector<1x4xf32>
        %24 = vector.shape_cast %23 : vector<1x4xf32> to vector<1x1x4xf32>
        %cst_18 = arith.constant dense<0x7F800000> : vector<1xf32>
        %25 = vector.multi_reduction <minimumf>, %24, %cst_18 [1, 2] : vector<1x1x4xf32> to vector<1xf32>
        %26 = vector.shape_cast %25 : vector<1xf32> to vector<1x1x1xf32>
        %27 = vector.extract %26[0, 0, 0] : f32 from vector<1x1x1xf32>
        %28 = vector.broadcast %27 : f32 to vector<1x4xf32>
        %29 = arith.cmpf oeq, %23, %28 : vector<1x4xf32>
        %c4_i32 = arith.constant 4 : i32
        %30 = vector.broadcast %c4_i32 : i32 to vector<1x4xi32>
        %31 = arith.select %29, %12, %30 : vector<1x4xi1>, vector<1x4xi32>
        %32 = vector.shape_cast %31 : vector<1x4xi32> to vector<1x1x4xi32>
        %cst_19 = arith.constant dense<2147483647> : vector<1xi32>
        %33 = vector.multi_reduction <minsi>, %32, %cst_19 [1, 2] : vector<1x1x4xi32> to vector<1xi32>
        %34 = vector.shape_cast %33 : vector<1xi32> to vector<1x1x1xi32>
        %35 = vector.extract %34[0, 0, 0] : i32 from vector<1x1x1xi32>
        %36 = vector.broadcast %35 : i32 to vector<1x4xi32>
        %37 = arith.cmpi eq, %12, %36 : vector<1x4xi32>
        %38 = arith.extui %37 : vector<1x4xi1> to vector<1x4xi32>
        %39 = arith.sitofp %38 : vector<1x4xi32> to vector<1x4xf32>
        %40 = arith.mulf %arg4, %23 : vector<1x4xf32>
        %41 = vector.shape_cast %40 : vector<1x4xf32> to vector<1x1x4xf32>
        %cst_20 = arith.constant dense<0.000000e+00> : vector<1xf32>
        %42 = vector.multi_reduction <add>, %41, %cst_20 [1, 2] : vector<1x1x4xf32> to vector<1xf32>
        %43 = vector.shape_cast %42 : vector<1xf32> to vector<1x1x1xf32>
        %44 = vector.extract %43[0, 0, 0] : f32 from vector<1x1x1xf32>
        %45 = arith.mulf %23, %39 : vector<1x4xf32>
        %46 = vector.shape_cast %45 : vector<1x4xf32> to vector<1x1x4xf32>
        %cst_21 = arith.constant dense<0.000000e+00> : vector<1xf32>
        %47 = vector.multi_reduction <add>, %46, %cst_21 [1, 2] : vector<1x1x4xf32> to vector<1xf32>
        %48 = vector.shape_cast %47 : vector<1xf32> to vector<1x1x1xf32>
        %49 = vector.extract %48[0, 0, 0] : f32 from vector<1x1x1xf32>
        %50 = arith.mulf %19, %39 : vector<1x4xf32>
        %51 = vector.shape_cast %50 : vector<1x4xf32> to vector<1x1x4xf32>
        %cst_22 = arith.constant dense<0.000000e+00> : vector<1xf32>
        %52 = vector.multi_reduction <add>, %51, %cst_22 [1, 2] : vector<1x1x4xf32> to vector<1xf32>
        %53 = vector.shape_cast %52 : vector<1xf32> to vector<1x1x1xf32>
        %54 = vector.extract %53[0, 0, 0] : f32 from vector<1x1x1xf32>
        %55 = arith.cmpf oge, %49, %44 : f32
        %56 = arith.cmpf oge, %49, %54 : f32
        %57 = arith.subf %54, %49 : f32
        %58 = arith.addf %44, %54 : f32
        %cst_23 = arith.constant 2.000000e+00 : f32
        %59 = arith.mulf %cst_23, %49 : f32
        %60 = arith.subf %58, %59 : f32
        %61 = arith.divf %57, %60 : f32
        %cst_24 = arith.constant 1.000000e-03 : f32
        %62 = arith.select %56, %cst_24, %61 : f32
        %cst_25 = arith.constant 9.990000e-01 : f32
        %63 = arith.select %55, %cst_25, %62 : f32
        %64 = vector.broadcast %63 : f32 to vector<1x4xf32>
        %65 = arith.mulf %64, %arg4 : vector<1x4xf32>
        %cst_26 = arith.constant 1.000000e+00 : f32
        %66 = arith.subf %cst_26, %63 : f32
        %67 = vector.broadcast %66 : f32 to vector<1x4xf32>
        %68 = arith.mulf %67, %39 : vector<1x4xf32>
        %69 = arith.addf %65, %68 : vector<1x4xf32>
        %70 = arith.subf %69, %arg4 : vector<1x4xf32>
        %71 = math.absf %70 : vector<1x4xf32>
        %72 = vector.shape_cast %71 : vector<1x4xf32> to vector<1x1x4xf32>
        %cst_27 = arith.constant dense<0.000000e+00> : vector<1xf32>
        %73 = vector.multi_reduction <add>, %72, %cst_27 [1, 2] : vector<1x1x4xf32> to vector<1xf32>
        %74 = vector.shape_cast %73 : vector<1xf32> to vector<1x1x1xf32>
        %75 = vector.extract %74[0, 0, 0] : f32 from vector<1x1x1xf32>
        %c1_i32 = arith.constant 1 : i32
        %76 = arith.addi %arg5, %c1_i32 : i32
        scf.yield %69, %76, %75 : vector<1x4xf32>, i32, f32
      }
      %c0_15 = arith.constant 0 : index
      %c0_16 = arith.constant 0 : index
      %22 = vector.load %arg2[%c0_15, %c0_16] : memref<1x4xf32, #tpu.memory_space<vmem>>, vector<1x4xf32>
      tpu.vector_store %arg2[%c0_15, %c0_16], %21#0 {strides = array<i32>} : memref<1x4xf32, #tpu.memory_space<vmem>>, vector<1x4xf32>,
    } else {
    }
    return
  }
  func.func @transform_0(%arg0: i32) -> (i32, i32) {
    %c0_i32 = arith.constant 0 : i32
    %c0_i32_0 = arith.constant 0 : i32
    return %c0_i32, %arg0 : i32, i32
  }
  func.func @transform_1(%arg0: i32) -> (i32, i32) {
    %c0_i32 = arith.constant 0 : i32
    %c0_i32_0 = arith.constant 0 : i32
    %c0_i32_1 = arith.constant 0 : i32
    return %c0_i32, %c0_i32_0 : i32, i32
  }
}

</mosaic_0001>

<bundles_post_ra>
// kernel: tpu_custom_call.1
= control target key start
LH: loop header
LB: loop body
LE: loop exit
PB: predicated region body
PF: predicated region fallthrough
CT: control target
= control target key end

     0   :  { %6 = vsyncpa [#allocation4], 0  ;;  %s616_s0 = inlined_call_operand.hbm [shape: f32[4,512], index: 0, kind: input, shape index: {}]   ;;  %s617_s1 = inlined_call_operand.hbm [shape: f32[1,4], index: 1, kind: output, shape index: {}]  }
   0x1   :  { %7 = vsyncpa [#allocation5], 0  ;;  %s532_s6 = smov [#allocation3]   ;;  %s468_s10 = scalar_lea.hbm %s616_s0, 256 }
   0x2   :  { %s14_s7 = sshll.u32 %s532_s6, 4  ;;  %p469_p0 = scmp.ne.s32.totalorder %s616_s0, %s468_s10  ;;  %s15_s7 = int_to_ptr.vmem [resolvable:$true] %s14_s7 }
   0x3   :  { %p472_p1 = scmp.lt.u32.totalorder %s468_s10, %s616_s0 }
   0x5   :  { %p474_p2 = pnand %p472_p1, %p469_p0 }
   0x7   :  { %477 = shalt.err (!%p474_p2)
}
   0x8   :  { %s478_s15 = scalar_lea.vmem %s15_s7, 256  ;;  %p483_p4 = scmp.lt.s32.totalorder %s15_s7, %s15_s7 }
   0x9   :  { %p479_p3 = scmp.ne.s32.totalorder %s15_s7, %s478_s15  ;;  %p484_p5 = scmp.lt.s32.totalorder %s478_s15, %s478_s15 }
   0xb   :  { %p485_p6 = por %p484_p5, %p483_p4 }
   0xd   :  { %p486_p7 = pnand %p485_p6, %p479_p3 }
   0xf   :  { %489 = shalt.err (!%p486_p7)
}
  0x10   :  { %17 = dma.hbm_to_vmem [thread:$0]  %s616_s0, 256, %s15_s7, [#allocation4]  }
  0x11   :  { %520 = dma.done.wait [#allocation4], 256  }
  0x12   :  { %521 = vsyncadd [#allocation4], 4294967040  ;;  %vm25_vm0 = vcmask 27648   ;;  %v533_v0 = vmov 0.0   ;;  %v27_v1 = vld [vmem:[#allocation3] sm:$0xff]  ;;  %v28_v2 = vld [vmem:[#allocation3 + $0x8] sm:$0xff]  ;;  %v183_v11 = vlaneseq }
  0x13   :  { %26 = vst.msk [vmem:[#allocation2] sm:$0xf] %vm25_vm0, %v533_v0  ;;  %v32_v3 = vcombine.high %v27_v1, %v27_v1  ;;  %v33_v4 = vcombine.high %v28_v2, %v28_v2  ;;  %s570_s0 = smov 0   ;;  %v572_v24 = vmov 0.25  }
  0x14   :  { %v561_v13 = vand.u32 127, %v183_v11  ;;  %v186_v14 = vshrl.u32 %v183_v11, 7 }
  0x15   :  { %36 = vmatprep.subr.mxu0 %v32_v3  ;;  %106 = vmatprep.subr.mxu1 %v33_v4 }
  0x16   :  { %37 = vmatpush1.xpose.msra.mxu0 %v27_v1  ;;  %107 = vmatpush1.xpose.msra.mxu1 %v28_v2  ;;  %vm187_vm1 = vcmp.eq.s32.totalorder %v186_v14, %v561_v13 }
  0x17   :  { %100 = vmatprep.mubr.f32.mxu0 %v32_v3  ;;  %170 = vmatprep.mubr.f32.mxu1 %v33_v4 }
  0x19   :  { %101 = vmatmul.mubr.f32.vlgmr.msra.gmra.mrb[0].mxu0 %v27_v1  ;;  %171 = vmatmul.mubr.f32.vlgmr.msra.gmra.mrb[0].mxu1 %v28_v2 }
  0x1a   :  { %v29_v6 = vld [vmem:[#allocation2] sm:$0xf] }
  0xec   :  { %v102_v5 = vpop.f32.mrb[0].mxu0  ;;  %v172_v7 = vpop.f32.mrb[0].mxu1 }
  0xed   :  { %v173_v8 = vadd.f32 %v172_v7, %v102_v5  ;;  %v104_v9 = vpop.f32.mrb[1].mxu0  ;;  %v174_v10 = vpop.f32.mrb[1].mxu1 }
  0xef   :  { %v176_v12 = vadd.f32 %v173_v8, %v29_v6 }
  0xf1   :  { %178 = vst.msk [vmem:[#allocation2] sm:$0xf] %vm25_vm0, %v176_v12 }
  0xf8   :  { %v564_v15 = vld [vmem:[#allocation2] sm:$0xf] }
  0xf9   :  { %v188_v16 = vsel %vm187_vm1, %v564_v15, 0.0 }
  0xfa   :  { %v189_v17 = vsel %vm25_vm0, %v188_v16, 0.0 }
  0xfb   :  { %v190_v18 = vrot.slane %v189_v17, 4 }
  0xfd   :  { %v191_v19 = vadd.f32 %v190_v18, %v189_v17 }
  0xff   :  { %v192_v20 = vrot.slane %v191_v19, 2 }
 0x101   :  { %v193_v21 = vadd.f32 %v192_v20, %v191_v19 }
 0x103   :  { %v194_v22 = vrot.slane %v193_v21, 1 }
 0x105   :  { %v568_v23 = vadd.f32 %v194_v22, %v193_v21 }
 0x106 LB: > { %vm210_vm2 = vcmask 1043456   ;;  %v534_v25 = vmov 0.0   ;;  %vm535_vm3 = vmmov 0   ;;  %vm206_vm4 = vcmask 31744   ;;  %s390_s0 = sadd.s32 1, %s526_s0   ;;  %v530_v24 = vphi %v572_v24, %v618_v24   ;;  %s526_s0 = sphi %s570_s0, %s390_s0  }
 0x107   : > { %424 = vmatprep.subr.mxu0 %v534_v25  ;;  %426 = vmatprep.mubr.msk.f32.mxu0 %vm535_vm3, %v534_v25  ;;  %vm284_vm5 = vcmask 24576   ;;  %p200_p10 = scmp.lt.s32.totalorder %s390_s0, 250 }
 0x108   : > { %425 = vmatpush3.msk.msra.mxu0 %vm210_vm2, %v564_v15 }
 0x109   : > { %427 = vmatmul.mubr.msk.f32.vlgmr.msra.gmra.mrb[0].mxu0 %vm206_vm4, %v530_v24 }
 0x1dc   : > { %v280_v26 = vpop.f32.mrb[0].mxu0 }
 0x1dd   : > { %v428_v27 = vpop.f32.mrb[1].mxu0  ;;  %v285_v28 = vsel %vm284_vm5, %v280_v26, inf  ;;  %v327_v45 = vmul.f32 %v530_v24, %v280_v26 }
 0x1de   : > { %286 = vmin.xlane.f32.xlu0 %v285_v28 }
 0x1df   : > { %v328_v46 = vsel %vm284_vm5, %v327_v45, 0.0 }
 0x26b   : > { %v287_v29 = vpop.xlane.xlu0 %286 }
 0x26c   : > { %v288_v30 = vrot.slane %v287_v29, 4 }
 0x26e   : > { %v289_v31 = vmin.f32 %v287_v29, %v288_v30 }
 0x270   : > { %v290_v32 = vrot.slane %v289_v31, 2 }
 0x272   : > { %v291_v33 = vmin.f32 %v289_v31, %v290_v32 }
 0x274   : > { %v292_v34 = vrot.slane %v291_v33, 1 }
 0x276   : > { %v293_v35 = vmin.f32 %v291_v33, %v292_v34 }
 0x278   : > { %429 = vpush %v293_v35 }
 0x2a9   : > { %s430_s18 = spop %429 }
 0x2aa   : > { %v295_v36 = vstv %s430_s18 }
 0x2ab   : > { %vm296_vm6 = vcmp.eq.f32.partialorder %v280_v26, %v295_v36 }
 0x2ac   : > { %v297_v37 = vsel %vm296_vm6, %v561_v13, 4 }
 0x2ad   : > { %v298_v38 = vsel %vm284_vm5, %v297_v37, 2147483647 }
 0x2ae   : > { %v300_v39 = vshra.s32 %v298_v38, 16  ;;  %v299_v41 = vand.u32 65535, %v298_v38 }
 0x2b0   : > { %v302_v40 = vcvt.s32.f32 %v300_v39  ;;  %v301_v43 = vcvt.s32.f32 %v299_v41 }
 0x2b2   : > { %303 = vmin.xlane.f32.xlu0 %v302_v40 }
 0x33f   : > { %v304_v42 = vpop.xlane.xlu0 %303 }
 0x340   : > { %vm305_vm7 = vcmp.eq.f32.partialorder %v302_v40, %v304_v42  ;;  %v310_v47 = vcvt.f32.s32 %v304_v42 }
 0x341   : > { %v306_v44 = vsel %vm305_vm7, %v301_v43, inf }
 0x342   : > { %307 = vmin.xlane.f32.xlu1 %v306_v44  ;;  %v311_v49 = vshll.u32 %v310_v47, 16 }
 0x346   : > { %329 = vadd.xlane.f32.xlu1 %v328_v46 }
 0x3cf   : > { %v308_v48 = vpop.xlane.xlu1 %307 }
 0x3d0   : > { %v309_v50 = vcvt.f32.s32 %v308_v48 }
 0x3d2   : > { %v312_v51 = vadd.s32 %v311_v49, %v309_v50 }
 0x3d3   : > { %v330_v52 = vpop.xlane.xlu1 %329 }
 0x3d4   : > { %v313_v53 = vrot.slane %v312_v51, 4  ;;  %v331_v54 = vrot.slane %v330_v52, 4 }
 0x3d6   : > { %vm314_vm8 = vcmp.lt.s32.totalorder %v312_v51, %v313_v53  ;;  %v332_v55 = vadd.f32 %v331_v54, %v330_v52 }
 0x3d7   : > { %v315_v56 = vsel %vm314_vm8, %v312_v51, %v313_v53 }
 0x3d8   : > { %v333_v57 = vrot.slane %v332_v55, 2  ;;  %v316_v58 = vrot.slane %v315_v56, 2 }
 0x3da   : > { %vm317_vm9 = vcmp.lt.s32.totalorder %v315_v56, %v316_v58  ;;  %v334_v59 = vadd.f32 %v333_v57, %v332_v55 }
 0x3db   : > { %v318_v60 = vsel %vm317_vm9, %v315_v56, %v316_v58 }
 0x3dc   : > { %v319_v61 = vrot.slane %v318_v60, 1  ;;  %v335_v62 = vrot.slane %v334_v59, 1 }
 0x3de   : > { %vm320_vm10 = vcmp.lt.s32.totalorder %v318_v60, %v319_v61  ;;  %v336_v63 = vadd.f32 %v335_v62, %v334_v59 }
 0x3df   : > { %v321_v0 = vsel %vm320_vm10, %v318_v60, %v319_v61 }
 0x3e0   : > { %431 = vpush %v321_v0 }
 0x3e1   : > { %433 = vpush %v336_v63 }
 0x411   : > { %s432_s19 = spop %431 }
 0x412   : > { %v323_v1 = vstv %s432_s19  ;;  %s434_s20 = spop %433 }
 0x413   : > { %vm324_vm11 = vcmp.eq.s32.totalorder %v561_v13, %v323_v1 }
 0x414   : > { %v421_v2 = vsel %vm324_vm11, 1.0, %v534_v25 }
 0x415   : > { %v349_v3 = vmul.f32 %v421_v2, %v568_v23  ;;  %v338_v4 = vmul.f32 %v421_v2, %v280_v26 }
 0x417   : > { %v350_v5 = vsel %vm284_vm5, %v349_v3, 0.0  ;;  %v339_v6 = vsel %vm284_vm5, %v338_v4, 0.0 }
 0x418   : > { %351 = vadd.xlane.f32.xlu1 %v350_v5  ;;  %340 = vadd.xlane.f32.xlu0 %v339_v6 }
 0x4a5   : > { %v341_v7 = vpop.xlane.xlu0 %340  ;;  %v352_v8 = vpop.xlane.xlu1 %351 }
 0x4a6   : > { %v342_v9 = vrot.slane %v341_v7, 4  ;;  %v353_v10 = vrot.slane %v352_v8, 4 }
 0x4a8   : > { %v343_v11 = vadd.f32 %v342_v9, %v341_v7  ;;  %v354_v12 = vadd.f32 %v353_v10, %v352_v8 }
 0x4aa   : > { %v344_v14 = vrot.slane %v343_v11, 2  ;;  %v355_v16 = vrot.slane %v354_v12, 2 }
 0x4ac   : > { %v356_v17 = vadd.f32 %v355_v16, %v354_v12  ;;  %v345_v18 = vadd.f32 %v344_v14, %v343_v11 }
 0x4ae   : > { %v346_v19 = vrot.slane %v345_v18, 1  ;;  %v357_v20 = vrot.slane %v356_v17, 1 }
 0x4b0   : > { %v347_v21 = vadd.f32 %v346_v19, %v345_v18  ;;  %v358_v22 = vadd.f32 %v357_v20, %v356_v17 }
 0x4b2   : > { %435 = vpush %v347_v21 }
 0x4b3   : > { %437 = vpush %v358_v22 }
 0x4e3   : > { %s436_s21 = spop %435 }
 0x4e4   : > { %p360_p8 = scmp.ge.f32.partialorder %s436_s21, %s434_s20  ;;  %s364_s22 = smul.f32 2.0, %s436_s21 }
 0x4e5   : > { %s438_s23 = spop %437 }
 0x4e6   : > { %s363_s24 = sadd.f32 %s438_s23, %s434_s20  ;;  %p361_p9 = scmp.ge.f32.partialorder %s436_s21, %s438_s23 }
 0x4e7   : > { %s362_s26 = ssub.f32 %s438_s23, %s436_s21 }
 0x4e8   : > { %s365_s25 = ssub.f32 %s363_s24, %s364_s22 }
 0x4ea   : > { %v366_v25 = vstv %s365_s25 }
 0x4eb   : > { %466 = vrcp.f32 %v366_v25 }
 0x4f5   : > { %v467_v26 = vpop.eup %466 }
 0x4f6   : > { %439 = vpush %v467_v26 }
 0x527   : > { %s440_s27 = spop %439 }
 0x528   : > { %s369_s28 = smul.f32 %s440_s27, %s362_s26 }
 0x52a   : > { %s620_s28 = smov (%p361_p9, %s369_s28), 0.001 }
 0x52b   : > { %s622_s28 = smov (%p360_p8, %s620_s28), 0.999 }
 0x52c   : > { %v372_v27 = vstv %s622_s28  ;;  %s374_s29 = ssub.f32 1.0, %s622_s28 }
 0x52d   : > { %v373_v29 = vmul.f32 %v530_v24, %v372_v27 }
 0x52e   : > { %v375_v28 = vstv %s374_s29 }
 0x52f   : > { %v376_v30 = vmul.f32 %v421_v2, %v375_v28 }
 0x531   : > { %v377_v31 = vadd.f32 %v376_v30, %v373_v29  }
 0x533   : > { %v378_v32 = vsub.f32 %v377_v31, %v530_v24  ;;  %v618_v24 = vmov %v377_v31 }
 0x535   : > { %v379_v33 = vand.u32 2147483647, %v378_v32 }
 0x537   : > { %v380_v34 = vsel %vm284_vm5, %v379_v33, 0.0 }
 0x538   : > { %381 = vadd.xlane.f32.xlu0 %v380_v34 }
 0x5c5   : > { %v382_v35 = vpop.xlane.xlu0 %381 }
 0x5c6   : > { %v383_v36 = vrot.slane %v382_v35, 4 }
 0x5c8   : > { %v384_v37 = vadd.f32 %v383_v36, %v382_v35 }
 0x5ca   : > { %v385_v38 = vrot.slane %v384_v37, 2 }
 0x5cc   : > { %v386_v39 = vadd.f32 %v385_v38, %v384_v37 }
 0x5ce   : > { %v387_v40 = vrot.slane %v386_v39, 1 }
 0x5d0   : > { %v388_v41 = vadd.f32 %v387_v40, %v386_v39 }
 0x5d2   : > { %441 = vpush %v388_v41 }
 0x603   : > { %s442_s30 = spop %441 }
 0x604   : > { %p201_p11 = scmp.ge.f32.partialorder %s442_s30, 1e-06 }
 0x606   : > { %p202_p12 = pnand %p201_p11, %p200_p10 }
 0x607   :  { %392 = vst.msk [vmem:[#allocation6] sm:$0x1] (%p202_p12), %vm284_vm5, %v377_v31  ;;  %s536_s2 = smov (%p202_p12), [#allocation6]  }
 0x608   :  { %205 = sbr.rel (!%p202_p12) target bundleno = 262 (0x106), region = 43  ;;  %s399_s3 = sshll.u32 (%p202_p12), %s536_s2, 4  ;;  %s400_s3 = int_to_ptr.vmem [resolvable:$true] %s399_s3 }
 0x609   :  { %s490_s4 = scalar_lea.vmem (%p202_p12), %s400_s3, 16  ;;  %s494_s5 = scalar_lea.vmem (%p202_p12), %s400_s3, 32 }
 0x60a   :  { %p491_p13 = scmp.ne.s32.totalorder (%p202_p12), %s400_s3, %s490_s4  ;;  %p495_p0 = scmp.lt.s32.totalorder (%p202_p12), %s400_s3, %s400_s3 }
 0x60b   :  { %p496_p1 = scmp.lt.s32.totalorder (%p202_p12), %s494_s5, %s490_s4 }
 0x60d   :  { %p497_p2 = por (%p202_p12), %p496_p1, %p495_p0 }
 0x60f   :  { %p498_p3 = pnand %p497_p2, %p491_p13 }
 0x611   :  { %501 = shalt.err (!%p498_p3)
}
 0x612   :  { %s502_s8 = scalar_lea.hbm %s617_s1, 16 }
 0x613   :  { %p503_p4 = scmp.ne.s32.totalorder %s617_s1, %s502_s8  ;;  %p506_p5 = scmp.lt.u32.totalorder %s502_s8, %s617_s1 }
 0x615   :  { %p508_p6 = pnand %p506_p5, %p503_p4 }
 0x617   :  { %511 = shalt.err (!%p508_p6)
}
 0x618   :  { %402 = dma.vmem_to_hbm [thread:$0]  %s400_s3, 16, %s617_s1, [#allocation5]  }
 0x619   :  { %522 = dma.done.wait [#allocation5], 16  }
 0x61a   :  { %523 = vsyncadd [#allocation5], 4294967280 }
 0x61b   :  { %406 = vsyncpa [#allocation4], 1 }
 0x61c   :  { %407 = vsyncpa [#allocation5], 1 }

</bundles_post_ra>
